<compile_context>
chip_gen: v7x
topology: tpu7x:2x2x1
jax: 0.10.0
libtpu: 0.0.40
codegen_flags: <defaults>
</compile_context>

<pallas_src>
import functools

import jax
import jax.numpy as jnp
from jax.experimental import pallas as pl
from jax.experimental.pallas import tpu as pltpu


def _round_up(x, m):
    return ((x + m - 1) // m) * m


def _divisors(n):
    return [d for d in range(1, n + 1) if n % d == 0]


def _tpu_vmem_and_cores():
    """Best-effort (VMEM bytes per core, TensorCores per chip)."""
    vmem = 128 << 20
    cores = 1
    try:
        info = pltpu.get_tpu_info()
        v = getattr(info, "vmem_capacity_bytes", None)
        if v:
            vmem = int(v)
        for name in ("num_cores", "tensorcores_per_chip", "num_tensorcores",
                     "core_count"):
            c = getattr(info, name, None)
            if c:
                cores = int(c)
                break
    except Exception:
        pass
    return vmem, cores


def ffn_kernel(x_ref, w1_ref, b1_ref, w2_ref, b2_ref, o_ref, acc_ref):
    # x_ref: (tm, Dp), w1_ref: (Dp, tf), b1_ref: (1, tf) f32,
    # w2_ref: (tf, Dp), b2_ref: (1, Dp) f32, acc_ref: (tm, Dp) f32 scratch.
    f = pl.program_id(1)

    @pl.when(f == 0)
    def _():
        acc_ref[...] = jnp.zeros_like(acc_ref)

    # First matmul (MXU) with f32 accumulation; bias-add + ReLU in f32 (VPU).
    h = jnp.dot(x_ref[...], w1_ref[...], preferred_element_type=jnp.float32)
    h = jnp.maximum(h + b1_ref[...], 0.0)

    # Second matmul accumulates this F-tile's contribution.
    acc_ref[...] += jnp.dot(h.astype(w2_ref.dtype), w2_ref[...],
                            preferred_element_type=jnp.float32)

    @pl.when(f == pl.num_programs(1) - 1)
    def _():
        o_ref[...] = (acc_ref[...] + b2_ref[...]).astype(o_ref.dtype)


def feed_forward(x, w1, b1, w2, b2, *, tm=512, tf=512,
                 compute_dtype=jnp.bfloat16):
    """x: (batch, seq, embed_dim) -> (batch, seq, embed_dim).

    tm: requested row (token) tile.
    tf: requested ffn-dimension tile (will be snapped to a divisor of the
        128-rounded ffn_dim).
    compute_dtype: matmul operand dtype (default bf16 = MXU-native on
        v5e/v6e/v7x); accumulation, bias-add and ReLU stay in f32.
        Pass jnp.float32 for a tight-tolerance reference path.
        Pass bf16 weights to avoid any per-call weight cast.
    """
    B, S, D = x.shape
    F = w1.shape[1]
    assert w1.shape == (D, F) and w2.shape == (F, D)
    assert b1.shape == (F,) and b2.shape == (D,)
    M = B * S

    out_dtype = x.dtype
    cdt = jnp.dtype(x.dtype if compute_dtype is None else compute_dtype)
    in_item = cdt.itemsize
    out_item = jnp.dtype(out_dtype).itemsize
    sub = max(8, 32 // in_item)               # packed sublane multiple

    vmem_cap, cores = _tpu_vmem_and_cores()
    vmem_limit = min(int(0.90 * vmem_cap), 104 * 1024 * 1024)
    tile_budget = int(0.65 * vmem_cap)        # headroom for internal scratch

    # --- lane-dense padded dims -------------------------------------------
    Dp = _round_up(D, 128)
    Fp = _round_up(F, 128)

    # --- row tile ----------------------------------------------------------
    m_rounded = _round_up(M, sub)
    tm_eff = _round_up(min(tm, m_rounded), sub)
    # v7x: keep >= 2 row blocks so both TensorCores get work on the parallel axis.
    if cores >= 2 and m_rounded >= 2 * sub:
        tm_eff = min(tm_eff, _round_up((m_rounded + 1) // 2, sub))

    # --- ffn tile: largest divisor of Fp (in 128-lane blocks) <= request ----
    nb = Fp // 128
    tf_req = max(128, _round_up(min(tf, Fp), 128))
    tf_candidates = sorted(
        [128 * d for d in _divisors(nb) if 128 * d <= tf_req], reverse=True)
    if not tf_candidates:
        tf_candidates = [128]

    def working_set(tm_, tf_):
        return (2 * tm_ * Dp * in_item          # x tile (double-buffered)
                + 2 * Dp * tf_ * in_item        # w1 tile
                + 2 * tf_ * Dp * in_item        # w2 tile
                + 2 * tf_ * 4 + 2 * Dp * 4      # biases (f32)
                + 2 * tm_ * Dp * out_item       # out tile
                + tm_ * Dp * 4)                 # f32 accumulator scratch

    tf_eff = tf_candidates[-1]
    while True:
        fitted = next((c for c in tf_candidates
                       if working_set(tm_eff, c) <= tile_budget), None)
        if fitted is not None:
            tf_eff = fitted
            break
        if tm_eff <= sub:
            tf_eff = tf_candidates[-1]          # smallest tf; let compiler cope
            break
        tm_eff = _round_up(tm_eff // 2, sub)

    Mp = _round_up(M, tm_eff)
    nm = Mp // tm_eff
    nf = Fp // tf_eff

    # --- operands: avoid per-call pad/cast when already TPU-friendly --------
    def maybe_pad2d(a, rows, cols, pr, pc, dtype):
        if a.shape == (pr, pc) and a.dtype == dtype:
            return a                             # zero-copy fast path
        out = jnp.zeros((pr, pc), dtype)
        return out.at[:rows, :cols].set(a.astype(dtype))

    x2d = x.reshape(M, D)
    xp = maybe_pad2d(x2d, M, D, Mp, Dp, cdt)
    w1p = maybe_pad2d(w1, D, F, Dp, Fp, cdt)
    w2p = maybe_pad2d(w2, F, D, Fp, Dp, cdt)
    b1p = maybe_pad2d(b1.reshape(1, F), 1, F, 1, Fp, jnp.float32)
    b2p = maybe_pad2d(b2.reshape(1, D), 1, D, 1, Dp, jnp.float32)

    # --- cost estimate: weights are re-streamed once per row tile ----------
    def _bytes(a):
        return a.size * a.dtype.itemsize

    cost = pl.CostEstimate(
        flops=4 * Mp * Dp * Fp,                  # two matmuls, 2*M*D*F each
        transcendentals=0,
        bytes_accessed=(_bytes(xp)
                        + nm * (_bytes(w1p) + _bytes(w2p)
                                + _bytes(b1p) + _bytes(b2p))
                        + Mp * Dp * out_item),
    )

    out2d = pl.pallas_call(
        ffn_kernel,
        out_shape=jax.ShapeDtypeStruct((Mp, Dp), out_dtype),
        grid_spec=pltpu.PrefetchScalarGridSpec(
            num_scalar_prefetch=0,
            grid=(nm, nf),
            in_specs=[
                pl.BlockSpec((tm_eff, Dp), lambda i, f: (i, 0)),   # x rows
                pl.BlockSpec((Dp, tf_eff), lambda i, f: (0, f)),   # w1 cols
                pl.BlockSpec((1, tf_eff), lambda i, f: (0, f)),    # b1 tile
                pl.BlockSpec((tf_eff, Dp), lambda i, f: (f, 0)),   # w2 rows
                pl.BlockSpec((1, Dp), lambda i, f: (0, 0)),        # b2 resident
            ],
            out_specs=pl.BlockSpec((tm_eff, Dp), lambda i, f: (i, 0)),
            scratch_shapes=[pltpu.VMEM((tm_eff, Dp), jnp.float32)],
        ),
        compiler_params=pltpu.CompilerParams(
            dimension_semantics=("parallel", "arbitrary"),
            vmem_limit_bytes=vmem_limit,
        ),
        cost_estimate=cost,
    )(xp, w1p, b1p, w2p, b2p)

    if (Mp, Dp) != (M, D):
        out2d = out2d[:M, :D]
    return out2d.reshape(B, S, D)


def init_params(key, embed_dim, ffn_dim, dtype=jnp.float32):
    """Deterministic init mirroring nn.Linear's U(-1/sqrt(fan_in), 1/sqrt(fan_in))."""
    k1, k2, k3, k4 = jax.random.split(key, 4)
    bound1 = 1.0 / jnp.sqrt(embed_dim)
    bound2 = 1.0 / jnp.sqrt(ffn_dim)
    w1 = jax.random.uniform(k1, (embed_dim, ffn_dim), dtype, -bound1, bound1)
    b1 = jax.random.uniform(k2, (ffn_dim,), dtype, -bound1, bound1)
    w2 = jax.random.uniform(k3, (ffn_dim, embed_dim), dtype, -bound2, bound2)
    b2 = jax.random.uniform(k4, (embed_dim,), dtype, -bound2, bound2)
    return w1, b1, w2, b2


if __name__ == "__main__":
    # config['model'] = {'embed_dim': 32, 'ffn_dim': 64}
    batch, seq, embed_dim, ffn_dim = 2, 8, 32, 64

    key = jax.random.PRNGKey(0)
    kx, kp = jax.random.split(key)
    x = jax.random.normal(kx, (batch, seq, embed_dim), dtype=jnp.float32)
    w1, b1, w2, b2 = init_params(kp, embed_dim, ffn_dim)

    ref = jnp.maximum(x @ w1 + b1, 0.0) @ w2 + b2

    ff = jax.jit(functools.partial(feed_forward))
    ff_f32 = jax.jit(functools.partial(feed_forward, compute_dtype=jnp.float32))

    # Default bf16 compute path (MXU-peak dtype; f32 accumulation kept).
    out = jax.block_until_ready(ff(x, w1, b1, w2, b2))
    assert out.shape == (batch, seq, embed_dim)
    assert jnp.allclose(out, ref, atol=5e-2, rtol=5e-2)

    # f32 compute path (tight tolerance).
    out_f32 = jax.block_until_ready(ff_f32(x, w1, b1, w2, b2))
    assert jnp.allclose(out_f32, ref, atol=1e-5, rtol=1e-5)

    # Ragged token count exercises the wrapper-side padding path.
    x_r = x[:, :7, :]
    out_r = jax.block_until_ready(ff_f32(x_r, w1, b1, w2, b2))
    ref_r = jnp.maximum(x_r @ w1 + b1, 0.0) @ w2 + b2
    assert jnp.allclose(out_r, ref_r, atol=1e-5, rtol=1e-5)

    print("KERNEL_OK")
</pallas_src>

<mosaic_0001>
module attributes {stable_mosaic.version = 11 : i64} {
  func.func @ffn_kernel(%arg0: i32, %arg1: i32, %arg2: memref<16x128xbf16, #tpu.memory_space<vmem>>, %arg3: memref<128x128xbf16, #tpu.memory_space<vmem>>, %arg4: memref<1x128xf32, #tpu.memory_space<vmem>>, %arg5: memref<128x128xbf16, #tpu.memory_space<vmem>>, %arg6: memref<1x128xf32, #tpu.memory_space<vmem>>, %arg7: memref<16x128xf32, #tpu.memory_space<vmem>>, %arg8: memref<16x128xf32, #tpu.memory_space<vmem>>) attributes {dimension_semantics = [#tpu.dimension_semantics<parallel>, #tpu.dimension_semantics<arbitrary>], iteration_bounds = array<i64: 1, 1>, scalar_prefetch = 0 : i64, scratch_operands = 1 : i64, tpu.core_type = #tpu.core_type<tc>, window_params = [{transform_indices = @transform_0, window_bounds = array<i64: 16, 128>}, {transform_indices = @transform_1, window_bounds = array<i64: 128, 128>}, {transform_indices = @transform_2, window_bounds = array<i64: 1, 128>}, {transform_indices = @transform_3, window_bounds = array<i64: 128, 128>}, {pipeline_mode = #tpu.pipeline_mode<synchronous>, transform_indices = @transform_4, window_bounds = array<i64: 1, 128>}, {transform_indices = @transform_5, window_bounds = array<i64: 16, 128>}]} {
    %c0_i32 = arith.constant 0 : i32
    %0 = arith.cmpi eq, %arg1, %c0_i32 : i32
    %1 = arith.extui %0 : i1 to i32
    %c0_i32_0 = arith.constant 0 : i32
    %2 = arith.cmpi ne, %1, %c0_i32_0 : i32
    scf.if %2 {
      %cst_16 = arith.constant 0.000000e+00 : f32
      %20 = vector.broadcast %cst_16 : f32 to vector<16x128xf32>
      %c0_17 = arith.constant 0 : index
      %c0_18 = arith.constant 0 : index
      %21 = vector.load %arg8[%c0_17, %c0_18] : memref<16x128xf32, #tpu.memory_space<vmem>>, vector<16x128xf32>
      tpu.vector_store %arg8[%c0_17, %c0_18], %20 {strides = array<i32>} : memref<16x128xf32, #tpu.memory_space<vmem>>, vector<16x128xf32>,
    } else {
    }
    %c0 = arith.constant 0 : index
    %c0_1 = arith.constant 0 : index
    %3 = vector.load %arg2[%c0, %c0_1] : memref<16x128xbf16, #tpu.memory_space<vmem>>, vector<16x128xbf16>
    %c0_2 = arith.constant 0 : index
    %c0_3 = arith.constant 0 : index
    %4 = vector.load %arg3[%c0_2, %c0_3] : memref<128x128xbf16, #tpu.memory_space<vmem>>, vector<128x128xbf16>
    %cst = arith.constant dense<0.000000e+00> : vector<16x128xf32>
    %5 = tpu.matmul %3, %4, %cst {dimension_numbers = #tpu.dot_dimension_numbers<[1], [0], [0], [1], [0, 0, 1, 1], [], []>} : vector<16x128xbf16>, vector<128x128xbf16>, vector<16x128xf32> -> vector<16x128xf32>
    %c0_4 = arith.constant 0 : index
    %c0_5 = arith.constant 0 : index
    %6 = vector.load %arg4[%c0_4, %c0_5] : memref<1x128xf32, #tpu.memory_space<vmem>>, vector<1x128xf32>
    %7 = vector.broadcast %6 : vector<1x128xf32> to vector<16x128xf32>
    %8 = arith.addf %5, %7 : vector<16x128xf32>
    %cst_6 = arith.constant 0.000000e+00 : f32
    %9 = vector.broadcast %cst_6 : f32 to vector<16x128xf32>
    %10 = arith.maximumf %8, %9 : vector<16x128xf32>
    %c0_7 = arith.constant 0 : index
    %c0_8 = arith.constant 0 : index
    %11 = vector.load %arg8[%c0_7, %c0_8] : memref<16x128xf32, #tpu.memory_space<vmem>>, vector<16x128xf32>
    %12 = arith.truncf %10 : vector<16x128xf32> to vector<16x128xbf16>
    %c0_9 = arith.constant 0 : index
    %c0_10 = arith.constant 0 : index
    %13 = vector.load %arg5[%c0_9, %c0_10] : memref<128x128xbf16, #tpu.memory_space<vmem>>, vector<128x128xbf16>
    %cst_11 = arith.constant dense<0.000000e+00> : vector<16x128xf32>
    %14 = tpu.matmul %12, %13, %cst_11 {dimension_numbers = #tpu.dot_dimension_numbers<[1], [0], [0], [1], [0, 0, 1, 1], [], []>} : vector<16x128xbf16>, vector<128x128xbf16>, vector<16x128xf32> -> vector<16x128xf32>
    %15 = arith.addf %11, %14 : vector<16x128xf32>
    %c0_12 = arith.constant 0 : index
    %c0_13 = arith.constant 0 : index
    %16 = vector.load %arg8[%c0_12, %c0_13] : memref<16x128xf32, #tpu.memory_space<vmem>>, vector<16x128xf32>
    tpu.vector_store %arg8[%c0_12, %c0_13], %15 {strides = array<i32>} : memref<16x128xf32, #tpu.memory_space<vmem>>, vector<16x128xf32>,
    %c0_i32_14 = arith.constant 0 : i32
    %17 = arith.cmpi eq, %arg1, %c0_i32_14 : i32
    %18 = arith.extui %17 : i1 to i32
    %c0_i32_15 = arith.constant 0 : i32
    %19 = arith.cmpi ne, %18, %c0_i32_15 : i32
    scf.if %19 {
      %c0_16 = arith.constant 0 : index
      %c0_17 = arith.constant 0 : index
      %20 = vector.load %arg8[%c0_16, %c0_17] : memref<16x128xf32, #tpu.memory_space<vmem>>, vector<16x128xf32>
      %c0_18 = arith.constant 0 : index
      %c0_19 = arith.constant 0 : index
      %21 = vector.load %arg6[%c0_18, %c0_19] : memref<1x128xf32, #tpu.memory_space<vmem>>, vector<1x128xf32>
      %22 = vector.broadcast %21 : vector<1x128xf32> to vector<16x128xf32>
      %23 = arith.addf %20, %22 : vector<16x128xf32>
      %c0_20 = arith.constant 0 : index
      %c0_21 = arith.constant 0 : index
      %24 = vector.load %arg7[%c0_20, %c0_21] : memref<16x128xf32, #tpu.memory_space<vmem>>, vector<16x128xf32>
      tpu.vector_store %arg7[%c0_20, %c0_21], %23 {strides = array<i32>} : memref<16x128xf32, #tpu.memory_space<vmem>>, vector<16x128xf32>,
    } else {
    }
    return
  }
  func.func @transform_0(%arg0: i32, %arg1: i32) -> (i32, i32) {
    %c0_i32 = arith.constant 0 : i32
    %c0_i32_0 = arith.constant 0 : i32
    return %arg0, %c0_i32 : i32, i32
  }
  func.func @transform_1(%arg0: i32, %arg1: i32) -> (i32, i32) {
    %c0_i32 = arith.constant 0 : i32
    %c0_i32_0 = arith.constant 0 : i32
    return %c0_i32, %arg1 : i32, i32
  }
  func.func @transform_2(%arg0: i32, %arg1: i32) -> (i32, i32) {
    %c0_i32 = arith.constant 0 : i32
    %c0_i32_0 = arith.constant 0 : i32
    return %c0_i32, %arg1 : i32, i32
  }
  func.func @transform_3(%arg0: i32, %arg1: i32) -> (i32, i32) {
    %c0_i32 = arith.constant 0 : i32
    %c0_i32_0 = arith.constant 0 : i32
    return %arg1, %c0_i32 : i32, i32
  }
  func.func @transform_4(%arg0: i32, %arg1: i32) -> (i32, i32) {
    %c0_i32 = arith.constant 0 : i32
    %c0_i32_0 = arith.constant 0 : i32
    %c0_i32_1 = arith.constant 0 : i32
    return %c0_i32, %c0_i32_0 : i32, i32
  }
  func.func @transform_5(%arg0: i32, %arg1: i32) -> (i32, i32) {
    %c0_i32 = arith.constant 0 : i32
    %c0_i32_0 = arith.constant 0 : i32
    return %arg0, %c0_i32 : i32, i32
  }
}

</mosaic_0001>

<bundles_post_ra>
// kernel: feed_forward.1
= control target key start
LH: loop header
LB: loop body
LE: loop exit
PB: predicated region body
PF: predicated region fallthrough
CT: control target
= control target key end

     0   :  { %10 = vsyncpa [#allocation4], 0  ;;  %s737_s0 = inlined_call_operand.hbm [shape: bf16[16,128], index: 0, kind: input, shape index: {}]   ;;  %s738_s1 = inlined_call_operand.hbm [shape: bf16[128,128], index: 1, kind: input, shape index: {}]   ;;  %s739_s2 = inlined_call_operand.hbm [shape: f32[1,128], index: 2, kind: input, shape index: {}]   ;;  %s740_s3 = inlined_call_operand.hbm [shape: bf16[128,128], index: 3, kind: input, shape index: {}]   ;;  %s741_s4 = inlined_call_operand.hbm [shape: f32[1,128], index: 4, kind: input, shape index: {}]   ;;  %s742_s5 = inlined_call_operand.hbm [shape: f32[16,128], index: 5, kind: output, shape index: {}]  }
   0x1   :  { %11 = vsyncpa [#allocation7], 0 }
   0x2   :  { %12 = vsyncpa [#allocation10], 0 }
   0x3   :  { %13 = vsyncpa [#allocation5], 0  ;;  %s607_s18 = smov [#allocation6]   ;;  %s608_s20 = smov [#allocation9]  }
   0x4   :  { %s31_s19 = sshll.u32 %s607_s18, 4  ;;  %s53_s21 = sshll.u32 %s608_s20, 4  ;;  %s32_s19 = int_to_ptr.vmem [resolvable:$true] %s31_s19  ;;  %s649_s21 = int_to_ptr.vmem [resolvable:$true] %s53_s21 }
   0x5   :  { %s467_s24 = scalar_lea.hbm %s738_s1, 1024 }
   0x6   :  { %p468_p0 = scmp.ne.s32.totalorder %s738_s1, %s467_s24  ;;  %p471_p1 = scmp.lt.u32.totalorder %s467_s24, %s738_s1 }
   0x8   :  { %p473_p2 = pnand %p471_p1, %p468_p0 }
   0xa   :  { %476 = shalt.err (!%p473_p2)
}
   0xb   :  { %s477_s29 = scalar_lea.vmem %s32_s19, 1024  ;;  %p482_p4 = scmp.lt.s32.totalorder %s32_s19, %s32_s19 }
   0xc   :  { %p478_p3 = scmp.ne.s32.totalorder %s32_s19, %s477_s29  ;;  %p483_p5 = scmp.lt.s32.totalorder %s477_s29, %s477_s29 }
   0xe   :  { %p484_p6 = por %p483_p5, %p482_p4 }
  0x10   :  { %p485_p7 = pnand %p484_p6, %p478_p3 }
  0x12   :  { %488 = shalt.err (!%p485_p7)
}
  0x13   :  { %s609_s30 = smov 64   ;;  %s610_s6 = smov 4  }
  0x14   :  { %37 = dma.hbm_to_vmem [thread:$0]  %s738_s1, 1024, %s32_s19, [#allocation7], %s609_s30, %s609_s30, %s610_s6  }
  0x15   :  { %s489_s11 = scalar_lea.hbm %s740_s3, 1024 }
  0x16   :  { %p490_p8 = scmp.ne.s32.totalorder %s740_s3, %s489_s11  ;;  %p493_p9 = scmp.lt.u32.totalorder %s489_s11, %s740_s3 }
  0x18   :  { %p495_p10 = pnand %p493_p9, %p490_p8 }
  0x1a   :  { %498 = shalt.err (!%p495_p10)
}
  0x1b   :  { %s499_s16 = scalar_lea.vmem %s649_s21, 1024  ;;  %p504_p12 = scmp.lt.s32.totalorder %s649_s21, %s649_s21 }
  0x1c   :  { %p500_p11 = scmp.ne.s32.totalorder %s649_s21, %s499_s16  ;;  %p505_p13 = scmp.lt.s32.totalorder %s499_s16, %s499_s16 }
  0x1e   :  { %p506_p0 = por %p505_p13, %p504_p12 }
  0x20   :  { %p507_p1 = pnand %p506_p0, %p500_p11 }
  0x22   :  { %510 = shalt.err (!%p507_p1)
}
  0x23   :  { %59 = dma.hbm_to_vmem [thread:$0]  %s740_s3, 1024, %s649_s21, [#allocation10], %s609_s30, %s609_s30, %s610_s6  }
  0x24   :  { %s611_s18 = smov [#allocation3]   ;;  %s612_s20 = smov [#allocation8]  }
  0x25   :  { %s19_s19 = sshll.u32 %s611_s18, 4  ;;  %s44_s22 = sshll.u32 %s612_s20, 4  ;;  %s20_s19 = int_to_ptr.vmem [resolvable:$true] %s19_s19  ;;  %s45_s22 = int_to_ptr.vmem [resolvable:$true] %s44_s22 }
  0x26   :  { %s511_s25 = scalar_lea.hbm %s737_s0, 128 }
  0x27   :  { %p512_p2 = scmp.ne.s32.totalorder %s737_s0, %s511_s25  ;;  %p515_p3 = scmp.lt.u32.totalorder %s511_s25, %s737_s0 }
  0x29   :  { %p517_p4 = pnand %p515_p3, %p512_p2 }
  0x2b   :  { %520 = shalt.err (!%p517_p4)
}
  0x2c   :  { %s521_s3 = scalar_lea.vmem %s20_s19, 128  ;;  %p526_p6 = scmp.lt.s32.totalorder %s20_s19, %s20_s19 }
  0x2d   :  { %p522_p5 = scmp.ne.s32.totalorder %s20_s19, %s521_s3  ;;  %p527_p7 = scmp.lt.s32.totalorder %s521_s3, %s521_s3 }
  0x2f   :  { %p528_p8 = por %p527_p7, %p526_p6 }
  0x31   :  { %p529_p9 = pnand %p528_p8, %p522_p5 }
  0x33   :  { %532 = shalt.err (!%p529_p9)
}
  0x34   :  { %25 = dma.hbm_to_vmem [thread:$0]  %s737_s0, 128, %s20_s19, [#allocation4], %s609_s30, %s609_s30, %s610_s6  }
  0x35   :  { %s533_s10 = scalar_lea.hbm %s739_s2, 16 }
  0x36   :  { %p534_p10 = scmp.ne.s32.totalorder %s739_s2, %s533_s10  ;;  %p537_p11 = scmp.lt.u32.totalorder %s533_s10, %s739_s2 }
  0x38   :  { %p539_p12 = pnand %p537_p11, %p534_p10 }
  0x3a   :  { %542 = shalt.err (!%p539_p12)
}
  0x3b   :  { %s543_s15 = scalar_lea.vmem %s45_s22, 16  ;;  %s547_s16 = scalar_lea.vmem %s45_s22, 32 }
  0x3c   :  { %p544_p13 = scmp.ne.s32.totalorder %s45_s22, %s543_s15  ;;  %p548_p0 = scmp.lt.s32.totalorder %s45_s22, %s45_s22 }
  0x3d   :  { %p549_p1 = scmp.lt.s32.totalorder %s547_s16, %s543_s15 }
  0x3f   :  { %p550_p2 = por %p549_p1, %p548_p0 }
  0x41   :  { %p551_p3 = pnand %p550_p2, %p544_p13 }
  0x43   :  { %554 = shalt.err (!%p551_p3)
}
  0x44   :  { %47 = dma.hbm_to_vmem [thread:$0]  %s739_s2, 16, %s45_s22, [#allocation7]  }
  0x45   :  { %s613_s6 = smov [#allocation11]   ;;  %s555_s19 = scalar_lea.hbm %s741_s4, 16 }
  0x46   :  { %s66_s1 = sshll.u32 %s613_s6, 4  ;;  %p556_p4 = scmp.ne.s32.totalorder %s741_s4, %s555_s19  ;;  %s67_s1 = int_to_ptr.vmem [resolvable:$true] %s66_s1 }
  0x47   :  { %p559_p5 = scmp.lt.u32.totalorder %s555_s19, %s741_s4 }
  0x49   :  { %p561_p6 = pnand %p559_p5, %p556_p4 }
  0x4b   :  { %564 = shalt.err (!%p561_p6)
}
  0x4c   :  { %s565_s26 = scalar_lea.vmem %s67_s1, 16  ;;  %s569_s2 = scalar_lea.vmem %s67_s1, 32 }
  0x4d   :  { %p566_p7 = scmp.ne.s32.totalorder %s67_s1, %s565_s26  ;;  %p570_p8 = scmp.lt.s32.totalorder %s67_s1, %s67_s1 }
  0x4e   :  { %p571_p9 = scmp.lt.s32.totalorder %s569_s2, %s565_s26 }
  0x50   :  { %p572_p10 = por %p571_p9, %p570_p8 }
  0x52   :  { %p573_p11 = pnand %p572_p10, %p566_p7 }
  0x54   :  { %576 = shalt.err (!%p573_p11)
}
  0x55   :  { %69 = dma.hbm_to_vmem [thread:$0]  %s741_s4, 16, %s67_s1, [#allocation10]  }
  0x56   :  { %599 = dma.done.wait [#allocation4], 128  }
  0x57   :  { %600 = vsyncadd [#allocation4], 4294967168 }
  0x58   :  { %601 = dma.done.wait [#allocation7], 1040  }
  0x59   :  { %602 = vsyncadd [#allocation7], 4294966256 }
  0x5a   :  { %603 = dma.done.wait [#allocation10], 1040  }
  0x5b   :  { %604 = vsyncadd [#allocation10], 4294966256  ;;  %v614_v0 = vmov 0.0   ;;  %vm615_vm0 = vmmov 0   ;;  %v450_v1 = vld [vmem:[#allocation6] sm:$0xff]   ;;  %v451_v2 = vld [vmem:[#allocation6 + $0x8] sm:$0xff]  }
  0x5c   :  { %398 = vmatprep.subr.bf16.mxu0 %v614_v0  ;;  %414 = vmatprep.mubr.msk.bf16.mxu0 %vm615_vm0, %v614_v0  ;;  %v452_v3 = vld [vmem:[#allocation6 + $0x10] sm:$0xff]   ;;  %v459_v4 = vld [vmem:[#allocation9] sm:$0xff]   ;;  %v453_v5 = vld [vmem:[#allocation6 + $0x18] sm:$0xff]   ;;  %s616_s4 = smov [#allocation12]  }
  0x5d   :  { %418 = vmatprep.subr.bf16.mxu1 %v614_v0  ;;  %434 = vmatprep.mubr.msk.bf16.mxu1 %vm615_vm0, %v614_v0  ;;  %v460_v6 = vld [vmem:[#allocation9 + $0x8] sm:$0xff]   ;;  %v454_v7 = vld [vmem:[#allocation6 + $0x20] sm:$0xff]   ;;  %v461_v8 = vld [vmem:[#allocation9 + $0x10] sm:$0xff]   ;;  %s347_s28 = sshll.u32 %s616_s4, 4  ;;  %s348_s28 = int_to_ptr.vmem [resolvable:$true] %s347_s28 }
  0x5e   :  { %399 = vmatpush3.bf16.msra.mxu0 %v450_v1  ;;  %419 = vmatpush3.bf16.msra.mxu1 %v459_v4  ;;  %v455_v9 = vld [vmem:[#allocation6 + $0x28] sm:$0xff]   ;;  %v462_v10 = vld [vmem:[#allocation9 + $0x18] sm:$0xff]   ;;  %v456_v11 = vld [vmem:[#allocation6 + $0x30] sm:$0xff]   ;;  %s577_s29 = scalar_lea.vmem %s348_s28, 256  ;;  %p582_p13 = scmp.lt.s32.totalorder %s348_s28, %s348_s28 }
  0x5f   :  { %400 = vmatprep.subr.bf16.mxu0 %v614_v0  ;;  %420 = vmatprep.subr.bf16.mxu1 %v614_v0  ;;  %v463_v12 = vld [vmem:[#allocation9 + $0x20] sm:$0xff]   ;;  %v457_v13 = vld [vmem:[#allocation6 + $0x38] sm:$0xff]   ;;  %v464_v14 = vld [vmem:[#allocation9 + $0x28] sm:$0xff]   ;;  %p578_p12 = scmp.ne.s32.totalorder %s348_s28, %s577_s29  ;;  %p583_p0 = scmp.lt.s32.totalorder %s577_s29, %s577_s29 }
  0x60   :  { %v458_v15 = vld [vmem:[#allocation3] sm:$0xff]   ;;  %v361_v18 = vld [vmem:[#allocation8] ss:$0 sm:$0xff]  ;;  %v379_v28 = vld [vmem:[#allocation11] ss:$0 sm:$0xff] }
  0x61   :  { %v465_v16 = vld [vmem:[#allocation9 + $0x30] sm:$0xff]   ;;  %v466_v17 = vld [vmem:[#allocation9 + $0x38] sm:$0xff]   ;;  %p584_p1 = por %p583_p0, %p582_p13 }
  0x62   :  { %401 = vmatpush3.bf16.msra.mxu0 %v451_v2  ;;  %421 = vmatpush3.bf16.msra.mxu1 %v460_v6 }
  0x63   :  { %402 = vmatprep.subr.bf16.mxu0 %v614_v0  ;;  %422 = vmatprep.subr.bf16.mxu1 %v614_v0  ;;  %p585_p2 = pnand %p584_p1, %p578_p12 }
  0x66   :  { %403 = vmatpush3.bf16.msra.mxu0 %v452_v3  ;;  %423 = vmatpush3.bf16.msra.mxu1 %v461_v8 }
  0x67   :  { %404 = vmatprep.subr.bf16.mxu0 %v614_v0  ;;  %424 = vmatprep.subr.bf16.mxu1 %v614_v0 }
  0x6a   :  { %405 = vmatpush3.bf16.msra.mxu0 %v453_v5  ;;  %425 = vmatpush3.bf16.msra.mxu1 %v462_v10 }
  0x6b   :  { %406 = vmatprep.subr.bf16.mxu0 %v614_v0  ;;  %426 = vmatprep.subr.bf16.mxu1 %v614_v0 }
  0x6e   :  { %407 = vmatpush3.bf16.msra.mxu0 %v454_v7  ;;  %427 = vmatpush3.bf16.msra.mxu1 %v463_v12 }
  0x6f   :  { %408 = vmatprep.subr.bf16.mxu0 %v614_v0  ;;  %428 = vmatprep.subr.bf16.mxu1 %v614_v0 }
  0x72   :  { %409 = vmatpush3.bf16.msra.mxu0 %v455_v9  ;;  %429 = vmatpush3.bf16.msra.mxu1 %v464_v14 }
  0x73   :  { %410 = vmatprep.subr.bf16.mxu0 %v614_v0  ;;  %430 = vmatprep.subr.bf16.mxu1 %v614_v0 }
  0x76   :  { %411 = vmatpush3.bf16.msra.mxu0 %v456_v11  ;;  %431 = vmatpush3.bf16.msra.mxu1 %v465_v16 }
  0x77   :  { %412 = vmatprep.subr.bf16.mxu0 %v614_v0  ;;  %432 = vmatprep.subr.bf16.mxu1 %v614_v0 }
  0x7a   :  { %413 = vmatpush3.bf16.msra.mxu0 %v457_v13  ;;  %433 = vmatpush3.bf16.msra.mxu1 %v466_v17 }
  0x7d   :  { %415 = vmatmul.mubr.bf16.vlgmr.msra.gmra.mrb[0].mxu0 %v458_v15 }
 0x150   :  { %v205_v19 = vpop.f32.mrb[0].mxu0 }
 0x151   :  { %v206_v20 = vadd.f32 %v361_v18, %v205_v19  ;;  %v416_v21 = vpop.f32.mrb[1].mxu0 }
 0x152   :  { %v208_v22 = vpop.f32.mrb[2].mxu0 }
 0x153   :  { %v209_v23 = vadd.f32 %v361_v18, %v208_v22  ;;  %v417_v24 = vpop.f32.mrb[3].mxu0  ;;  %v212_v25 = vmax.f32 %v206_v20, 0.0 }
 0x155   :  { %v213_v26 = vmax.f32 %v209_v23, 0.0 }
 0x157   :  { %v216_v27 = vpack.c.bf16 %v213_v26, %v212_v25 }
 0x159   :  { %435 = vmatmul.mubr.bf16.vlgmr.msra.gmra.mrb[0].mxu1 %v216_v27 }
 0x22c   :  { %v315_v29 = vpop.f32.mrb[0].mxu1 }
 0x22d   :  { %v338_v30 = vadd.f32 %v379_v28, %v315_v29  ;;  %v436_v31 = vpop.f32.mrb[1].mxu1 }
 0x22e   :  { %v318_v32 = vpop.f32.mrb[2].mxu1 }
 0x22f   :  { %340 = vst [vmem:[#allocation12] sm:$0xff] %v338_v30  ;;  %v339_v33 = vadd.f32 %v379_v28, %v318_v32  ;;  %v437_v34 = vpop.f32.mrb[3].mxu1 }
 0x231   :  { %341 = vst [vmem:[#allocation12 + $0x8] sm:$0xff] %v339_v33 }
 0x232   :  { %588 = shalt.err (!%p585_p2)
}
 0x233   :  { %s589_s7 = scalar_lea.hbm %s742_s5, 256 }
 0x234   :  { %p590_p3 = scmp.ne.s32.totalorder %s742_s5, %s589_s7  ;;  %p593_p4 = scmp.lt.u32.totalorder %s589_s7, %s742_s5 }
 0x236   :  { %p595_p5 = pnand %p593_p4, %p590_p3 }
 0x238   :  { %598 = shalt.err (!%p595_p5)
}
 0x239   :  { %s617_s12 = smov 128   ;;  %s618_s13 = smov 8  }
 0x23a   :  { %353 = dma.vmem_to_hbm [thread:$0]  %s348_s28, 256, %s742_s5, [#allocation5], %s617_s12, %s617_s12, %s618_s13  }
 0x23b   :  { %605 = dma.done.wait [#allocation5], 256  }
 0x23c   :  { %606 = vsyncadd [#allocation5], 4294967040 }
 0x23d   :  { %357 = vsyncpa [#allocation4], 1 }
 0x23e   :  { %358 = vsyncpa [#allocation7], 1 }
 0x23f   :  { %359 = vsyncpa [#allocation10], 1 }
 0x240   :  { %360 = vsyncpa [#allocation5], 1 }

</bundles_post_ra>
